<compile_context>
chip_gen: v6e
topology: v6e:2x2x1
jax: 0.10.0
libtpu: 0.0.40
codegen_flags: <defaults>
</compile_context>

<pallas_src>
import functools

import jax
import jax.numpy as jnp
from jax import lax
from jax.experimental import pallas as pl
from jax.experimental.pallas import tpu as pltpu


# ------------------------------ kernel ------------------------------------ #

def _pixel_unshuffle_kernel(x_ref, selc_ref, selr_ref, o_ref, *,
                            ratio, cb, H, W, precision):
    """One grid step: (1, cb, H, W) -> (1, cb*r*r, H//r, W//r)."""
    r = ratio
    Ho, Wo = H // r, W // r
    out_dtype = o_ref.dtype

    # Constant index_map => fetched once, stays VMEM-resident across the grid.
    selc = selc_ref[...]   # (W, W)  column (rx) selector
    selr = selr_ref[...]   # (H, H)  row    (ry) selector

    def per_channel(ch, carry):
        x2d = x_ref[0, ch]                                          # (H, W)
        # Column de-interleave: t[i, rx*Wo + j] = x2d[i, j*r + rx]
        t = jnp.dot(x2d, selc,
                    preferred_element_type=out_dtype, precision=precision)
        # Row de-interleave: d[ry*Ho + oy, rx*Wo + j] = x2d[oy*r + ry, j*r + rx]
        d = jnp.dot(selr, t,
                    preferred_element_type=out_dtype, precision=precision)
        base = ch * (r * r)
        # Tiny r*r loop stays unrolled; each store is one full (Ho, Wo) output
        # channel plane (contiguous in HBM).
        for ry in range(r):
            for rx in range(r):
                o_ref[0, base + ry * r + rx, :, :] = (
                    d[ry * Ho:(ry + 1) * Ho, rx * Wo:(rx + 1) * Wo])
        return carry

    # fori_loop keeps code size constant and live ranges bounded as cb grows.
    lax.fori_loop(0, cb, per_channel, 0)


# ------------------------------ selectors ---------------------------------- #

def _make_col_selector(W, ratio, dtype):
    """SelC: (W, r*Wo) with SelC[j*r + rx, rx*Wo + j] = 1."""
    Wo = W // ratio
    k = jnp.arange(W, dtype=jnp.int32)[:, None]            # source column
    n = jnp.arange(ratio * Wo, dtype=jnp.int32)[None, :]   # dest column rx*Wo+j
    return (k == (n % Wo) * ratio + (n // Wo)).astype(dtype)


def _make_row_selector(H, ratio, dtype):
    """SelR: (r*Ho, H) with SelR[ry*Ho + oy, oy*r + ry] = 1."""
    Ho = H // ratio
    m = jnp.arange(ratio * Ho, dtype=jnp.int32)[:, None]   # dest row ry*Ho+oy
    i = jnp.arange(H, dtype=jnp.int32)[None, :]            # source row
    return (i == (m % Ho) * ratio + (m // Ho)).astype(dtype)


# ------------------------------ sizing ------------------------------------- #

def _round_up(a, m):
    return (a + m - 1) // m * m


def _vmem_budget_and_limit():
    """Generation-aware VMEM sizing (v7x: 64 MiB/TC, v5e/v6e: 128 MiB)."""
    try:
        cap = int(pltpu.get_tpu_info().vmem_capacity_bytes)
    except Exception:
        cap = 0
    if cap <= 0:
        cap = 64 << 20                       # conservative: v7x per-TC VMEM
    limit = min(cap * 3 // 4, 100 << 20)     # ~48 MiB on v7x, ~96 MiB on v5e/v6e
    budget = limit * 4 // 5                  # headroom for compiler scratch
    return budget, limit


def _block_footprint_bytes(cb, H, W, ratio, itemsize):
    """VMEM per grid step incl. (sublane, lane) padding and double buffering."""
    Ho, Wo = H // ratio, W // ratio
    sub = max(8, 8 * (4 // max(itemsize, 1)))   # f32: 8, bf16: 16, int8: 32

    def pad2(s, l):
        return _round_up(s, sub) * _round_up(l, 128)

    in_blk = cb * pad2(H, W) * itemsize * 2                    # double-buffered
    out_blk = cb * ratio * ratio * pad2(Ho, Wo) * itemsize * 2  # double-buffered
    selc = pad2(W, W) * itemsize * 2                            # resident (2 bufs)
    selr = pad2(H, H) * itemsize * 2
    tmp = 2 * pad2(H, W) * max(itemsize, 4)                     # t and d values
    return in_blk + out_blk + selc + selr + tmp


def _pick_channel_block(B, C, H, W, ratio, itemsize, budget_bytes):
    divisors = [d for d in range(1, C + 1) if C % d == 0]
    fits = [d for d in divisors
            if _block_footprint_bytes(d, H, W, ratio, itemsize) <= budget_bytes]
    cb = max(fits) if fits else 1
    # Keep >= 2 parallel grid steps when possible (v7x has 2 TensorCores).
    while cb > 1 and B * (C // cb) < 2:
        cb = max(d for d in divisors if d < cb)
    return cb


# ------------------------------ wrapper ------------------------------------ #

def pixel_unshuffle_pallas(x, ratio=2):
    B, C, H, W = x.shape
    assert H % ratio == 0 and W % ratio == 0, \
        'x, y, ratio : {}, {}, {}'.format(W, H, ratio)
    assert jnp.issubdtype(x.dtype, jnp.floating), "float dtypes only"
    Ho, Wo = H // ratio, W // ratio
    itemsize = jnp.dtype(x.dtype).itemsize

    budget, vmem_limit = _vmem_budget_and_limit()
    cb = _pick_channel_block(B, C, H, W, ratio, itemsize, budget)
    nc = C // cb

    selc = _make_col_selector(W, ratio, x.dtype)    # (W, r*Wo) == (W, W)
    selr = _make_row_selector(H, ratio, x.dtype)    # (r*Ho, H) == (H, H)

    # f32 needs HIGHEST so the 0/1 selection stays bit-exact (no bf16 truncation
    # of the value operand); bf16 is exact at default precision.
    precision = (lax.Precision.HIGHEST if x.dtype == jnp.float32
                 else lax.Precision.DEFAULT)

    kernel = functools.partial(
        _pixel_unshuffle_kernel,
        ratio=ratio, cb=cb, H=H, W=W, precision=precision)

    flops = 2 * B * C * H * W * (H + W)            # two selector matmuls/channel
    bytes_accessed = (2 * B * C * H * W + H * H + W * W) * itemsize

    return pl.pallas_call(
        kernel,
        out_shape=jax.ShapeDtypeStruct((B, C * ratio * ratio, Ho, Wo), x.dtype),
        grid_spec=pltpu.PrefetchScalarGridSpec(
            num_scalar_prefetch=0,
            grid=(B, nc),
            in_specs=[
                pl.BlockSpec((1, cb, H, W), lambda b, c: (b, c, 0, 0)),
                # Constant block index => DMA'd once, stays VMEM-resident.
                pl.BlockSpec((W, ratio * Wo), lambda b, c: (0, 0)),
                pl.BlockSpec((ratio * Ho, H), lambda b, c: (0, 0)),
            ],
            out_specs=pl.BlockSpec(
                (1, cb * ratio * ratio, Ho, Wo), lambda b, c: (b, c, 0, 0)),
        ),
        compiler_params=pltpu.CompilerParams(
            dimension_semantics=("parallel", "parallel"),
            vmem_limit_bytes=vmem_limit,
        ),
        cost_estimate=pl.CostEstimate(
            flops=flops, transcendentals=0, bytes_accessed=bytes_accessed),
    )(x, selc, selr)


def pixel_unshuffle_ref(x, ratio=2):
    # Pure-JAX reference mirroring the PyTorch view/permute/view sequence.
    B, C, H, W = x.shape
    y = x.reshape(B, C, H // ratio, ratio, W // ratio, ratio)
    y = jnp.transpose(y, (0, 1, 3, 5, 2, 4))
    return y.reshape(B, C * ratio * ratio, H // ratio, W // ratio)


if __name__ == "__main__":
    key = jax.random.PRNGKey(0)
    k1, k2 = jax.random.split(key)

    # Primary check: module-consistent small shape, ratio=2, float32.
    x = jax.random.normal(k1, (2, 4, 16, 16), dtype=jnp.float32)
    out = jax.block_until_ready(pixel_unshuffle_pallas(x, ratio=2))
    exp = pixel_unshuffle_ref(x, ratio=2)
    assert out.shape == exp.shape, (out.shape, exp.shape)
    assert out.dtype == exp.dtype, (out.dtype, exp.dtype)
    assert jnp.array_equal(out, exp), "mismatch vs reference (r=2)"

    # Secondary check: different ratio, non-square plane, cb=1 / multi-step grid.
    x2 = jax.random.normal(k2, (1, 3, 32, 48), dtype=jnp.float32)
    out2 = jax.block_until_ready(pixel_unshuffle_pallas(x2, ratio=4))
    exp2 = pixel_unshuffle_ref(x2, ratio=4)
    assert out2.shape == exp2.shape, (out2.shape, exp2.shape)
    assert jnp.array_equal(out2, exp2), "mismatch vs reference (r=4)"

    print("KERNEL_OK")
</pallas_src>

<mosaic_0001>
module attributes {stable_mosaic.version = 11 : i64} {
  func.func @_pixel_unshuffle_kernel(%arg0: i32, %arg1: i32, %arg2: memref<1x4x16x16xf32, #tpu.memory_space<vmem>>, %arg3: memref<16x16xf32, #tpu.memory_space<vmem>>, %arg4: memref<16x16xf32, #tpu.memory_space<vmem>>, %arg5: memref<1x16x8x8xf32, #tpu.memory_space<vmem>>) attributes {dimension_semantics = [#tpu.dimension_semantics<parallel>, #tpu.dimension_semantics<parallel>], iteration_bounds = array<i64: 2, 1>, scalar_prefetch = 0 : i64, scratch_operands = 0 : i64, tpu.core_type = #tpu.core_type<tc>, window_params = [{transform_indices = @transform_0, window_bounds = array<i64: 1, 4, 16, 16>}, {pipeline_mode = #tpu.pipeline_mode<synchronous>, transform_indices = @transform_1, window_bounds = array<i64: 16, 16>}, {pipeline_mode = #tpu.pipeline_mode<synchronous>, transform_indices = @transform_2, window_bounds = array<i64: 16, 16>}, {transform_indices = @transform_3, window_bounds = array<i64: 1, 16, 8, 8>}]} {
    %c0 = arith.constant 0 : index
    %c0_0 = arith.constant 0 : index
    %0 = vector.load %arg3[%c0, %c0_0] : memref<16x16xf32, #tpu.memory_space<vmem>>, vector<16x16xf32>
    %c0_1 = arith.constant 0 : index
    %c0_2 = arith.constant 0 : index
    %1 = vector.load %arg4[%c0_1, %c0_2] : memref<16x16xf32, #tpu.memory_space<vmem>>, vector<16x16xf32>
    %c0_i32 = arith.constant 0 : i32
    %c4_i32 = arith.constant 4 : i32
    %2 = arith.addi %c0_i32, %c4_i32 : i32
    %c1_i32 = arith.constant 1 : i32
    scf.for %arg6 = %c0_i32 to %2 step %c1_i32  : i32 {
      %c0_4 = arith.constant 0 : index
      %3 = arith.index_cast %arg6 : i32 to index
      %c0_5 = arith.constant 0 : index
      %c0_6 = arith.constant 0 : index
      %4 = vector.load %arg2[%c0_4, %3, %c0_5, %c0_6] : memref<1x4x16x16xf32, #tpu.memory_space<vmem>>, vector<1x1x16x16xf32>
      %5 = vector.shape_cast %4 : vector<1x1x16x16xf32> to vector<16x16xf32>
      %cst = arith.constant dense<0.000000e+00> : vector<16x16xf32>
      %6 = tpu.matmul %5, %0, %cst {dimension_numbers = #tpu.dot_dimension_numbers<[1], [0], [0], [1], [0, 0, 1, 1], [], []>, precision = #tpu.contract_precision<fp32>} : vector<16x16xf32>, vector<16x16xf32>, vector<16x16xf32> -> vector<16x16xf32>
      %cst_7 = arith.constant dense<0.000000e+00> : vector<16x16xf32>
      %7 = tpu.matmul %1, %6, %cst_7 {dimension_numbers = #tpu.dot_dimension_numbers<[1], [0], [0], [1], [0, 0, 1, 1], [], []>, precision = #tpu.contract_precision<fp32>} : vector<16x16xf32>, vector<16x16xf32>, vector<16x16xf32> -> vector<16x16xf32>
      %c4_i32_8 = arith.constant 4 : i32
      %8 = arith.muli %arg6, %c4_i32_8 : i32
      %9 = vector.extract_strided_slice %7 {offsets = [0, 0], sizes = [8, 8], strides = [1, 1]} : vector<16x16xf32> to vector<8x8xf32>
      %c0_i32_9 = arith.constant 0 : i32
      %10 = arith.addi %8, %c0_i32_9 : i32
      %c0_i32_10 = arith.constant 0 : i32
      %11 = arith.addi %10, %c0_i32_10 : i32
      %c0_11 = arith.constant 0 : index
      %12 = arith.index_cast %11 : i32 to index
      %c0_12 = arith.constant 0 : index
      %c0_13 = arith.constant 0 : index
      %13 = vector.load %arg5[%c0_11, %12, %c0_12, %c0_13] : memref<1x16x8x8xf32, #tpu.memory_space<vmem>>, vector<1x1x8x8xf32>
      %14 = vector.shape_cast %13 : vector<1x1x8x8xf32> to vector<8x8xf32>
      %15 = vector.shape_cast %9 : vector<8x8xf32> to vector<1x1x8x8xf32>
      tpu.vector_store %arg5[%c0_11, %12, %c0_12, %c0_13], %15 {strides = array<i32>} : memref<1x16x8x8xf32, #tpu.memory_space<vmem>>, vector<1x1x8x8xf32>,
      %16 = vector.extract_strided_slice %7 {offsets = [0, 8], sizes = [8, 8], strides = [1, 1]} : vector<16x16xf32> to vector<8x8xf32>
      %c0_i32_14 = arith.constant 0 : i32
      %17 = arith.addi %8, %c0_i32_14 : i32
      %c1_i32_15 = arith.constant 1 : i32
      %18 = arith.addi %17, %c1_i32_15 : i32
      %c0_16 = arith.constant 0 : index
      %19 = arith.index_cast %18 : i32 to index
      %c0_17 = arith.constant 0 : index
      %c0_18 = arith.constant 0 : index
      %20 = vector.load %arg5[%c0_16, %19, %c0_17, %c0_18] : memref<1x16x8x8xf32, #tpu.memory_space<vmem>>, vector<1x1x8x8xf32>
      %21 = vector.shape_cast %20 : vector<1x1x8x8xf32> to vector<8x8xf32>
      %22 = vector.shape_cast %16 : vector<8x8xf32> to vector<1x1x8x8xf32>
      tpu.vector_store %arg5[%c0_16, %19, %c0_17, %c0_18], %22 {strides = array<i32>} : memref<1x16x8x8xf32, #tpu.memory_space<vmem>>, vector<1x1x8x8xf32>,
      %23 = vector.extract_strided_slice %7 {offsets = [8, 0], sizes = [8, 8], strides = [1, 1]} : vector<16x16xf32> to vector<8x8xf32>
      %c2_i32 = arith.constant 2 : i32
      %24 = arith.addi %8, %c2_i32 : i32
      %c0_i32_19 = arith.constant 0 : i32
      %25 = arith.addi %24, %c0_i32_19 : i32
      %c0_20 = arith.constant 0 : index
      %26 = arith.index_cast %25 : i32 to index
      %c0_21 = arith.constant 0 : index
      %c0_22 = arith.constant 0 : index
      %27 = vector.load %arg5[%c0_20, %26, %c0_21, %c0_22] : memref<1x16x8x8xf32, #tpu.memory_space<vmem>>, vector<1x1x8x8xf32>
      %28 = vector.shape_cast %27 : vector<1x1x8x8xf32> to vector<8x8xf32>
      %29 = vector.shape_cast %23 : vector<8x8xf32> to vector<1x1x8x8xf32>
      tpu.vector_store %arg5[%c0_20, %26, %c0_21, %c0_22], %29 {strides = array<i32>} : memref<1x16x8x8xf32, #tpu.memory_space<vmem>>, vector<1x1x8x8xf32>,
      %30 = vector.extract_strided_slice %7 {offsets = [8, 8], sizes = [8, 8], strides = [1, 1]} : vector<16x16xf32> to vector<8x8xf32>
      %c2_i32_23 = arith.constant 2 : i32
      %31 = arith.addi %8, %c2_i32_23 : i32
      %c1_i32_24 = arith.constant 1 : i32
      %32 = arith.addi %31, %c1_i32_24 : i32
      %c0_25 = arith.constant 0 : index
      %33 = arith.index_cast %32 : i32 to index
      %c0_26 = arith.constant 0 : index
      %c0_27 = arith.constant 0 : index
      %34 = vector.load %arg5[%c0_25, %33, %c0_26, %c0_27] : memref<1x16x8x8xf32, #tpu.memory_space<vmem>>, vector<1x1x8x8xf32>
      %35 = vector.shape_cast %34 : vector<1x1x8x8xf32> to vector<8x8xf32>
      %36 = vector.shape_cast %30 : vector<8x8xf32> to vector<1x1x8x8xf32>
      tpu.vector_store %arg5[%c0_25, %33, %c0_26, %c0_27], %36 {strides = array<i32>} : memref<1x16x8x8xf32, #tpu.memory_space<vmem>>, vector<1x1x8x8xf32>,
    }
    %c4_i32_3 = arith.constant 4 : i32
    return
  }
  func.func @transform_0(%arg0: i32, %arg1: i32) -> (i32, i32, i32, i32) {
    %c0_i32 = arith.constant 0 : i32
    %c0_i32_0 = arith.constant 0 : i32
    %c0_i32_1 = arith.constant 0 : i32
    return %arg0, %arg1, %c0_i32, %c0_i32_0 : i32, i32, i32, i32
  }
  func.func @transform_1(%arg0: i32, %arg1: i32) -> (i32, i32) {
    %c0_i32 = arith.constant 0 : i32
    %c0_i32_0 = arith.constant 0 : i32
    %c0_i32_1 = arith.constant 0 : i32
    return %c0_i32, %c0_i32_0 : i32, i32
  }
  func.func @transform_2(%arg0: i32, %arg1: i32) -> (i32, i32) {
    %c0_i32 = arith.constant 0 : i32
    %c0_i32_0 = arith.constant 0 : i32
    %c0_i32_1 = arith.constant 0 : i32
    return %c0_i32, %c0_i32_0 : i32, i32
  }
  func.func @transform_3(%arg0: i32, %arg1: i32) -> (i32, i32, i32, i32) {
    %c0_i32 = arith.constant 0 : i32
    %c0_i32_0 = arith.constant 0 : i32
    %c0_i32_1 = arith.constant 0 : i32
    return %arg0, %arg1, %c0_i32, %c0_i32_0 : i32, i32, i32, i32
  }
}

</mosaic_0001>

<bundles_post_ra>
// kernel: tpu_custom_call.1
= control target key start
LH: loop header
LB: loop body
LE: loop exit
PB: predicated region body
PF: predicated region fallthrough
CT: control target
= control target key end

     0   :  { %8 = vsyncpa [#allocation3], 0  ;;  %s2060_s0 = inlined_call_operand.hbm [shape: f32[2,4,16,16], index: 0, kind: input, shape index: {}]   ;;  %s2061_s1 = inlined_call_operand.hbm [shape: f32[16,16], index: 1, kind: input, shape index: {}]   ;;  %s2062_s2 = inlined_call_operand.hbm [shape: f32[16,16], index: 2, kind: input, shape index: {}]   ;;  %s2063_s3 = inlined_call_operand.vmem [shape: f32[2,16,8,8], index: 3, kind: output, shape index: {}]  }
   0x1   :  { %10 = vsyncpa [#allocation3 + $0x1], 0 }
   0x2   :  { %11 = vsyncpa [#allocation5], 0  ;;  %s1864_s12 = smov 0   ;;  %s1866_s13 = smov 0  }
   0x3   :  { %s1868_s14 = smov 0   ;;  %s1870_s15 = smov 0  }
   0x4   :  { %s1872_s16 = smov 0   ;;  %s1874_s17 = smov 0  }
   0x5 LB: > { %s1440_s18 = sadd.s32 4294967295, %s1832_s17   ;;  %p51_p0 = scmp.ne.s32.totalorder %s1816_s13, %s1812_s12  ;;  %s1832_s17 = sphi %s1874_s17, %s17_s17   ;;  %s1828_s16 = sphi %s1872_s16, %s2073_s16   ;;  %s1824_s15 = sphi %s1870_s15, %s2072_s15   ;;  %s1820_s14 = sphi %s1868_s14, %s2071_s14   ;;  %s1816_s13 = sphi %s1866_s13, %s2070_s13   ;;  %s1812_s12 = sphi %s1864_s12, %s2069_s12  }
   0x6   : > { %p1894_p1 = scmp.eq.s32.totalorder %s1440_s18, 0  ;;  %p1442_p2 = scmp.ge.s32.totalorder %s1832_s17, 1 }
   0x7   : > { %p132_p3 = scmp.lt.s32.totalorder %s1832_s17, 3  ;;  %s1838_s22 = smov [#allocation4]  }
   0x8   : > { %p1902_p4 = por %p1894_p1, %p51_p0  ;;  %s144_s23 = sshll.u32 %s1838_s22, 4  ;;  %s145_s23 = int_to_ptr.vmem [resolvable:$true] %s144_s23 }
   0x9   : > { %p1906_p5 = pnand %p1442_p2, %p132_p3  ;;  %s1839_s25 = smov [#allocation6]  }
   0xa   : > { %s157_s26 = sshll.u32 %s1839_s25, 4  ;;  %s1705_s27 = scalar_lea.vmem %s145_s23, 256  ;;  %s158_s26 = int_to_ptr.vmem [resolvable:$true] %s157_s26 }
   0xb   : > { %p1617_p6 = pneg %p1906_p5  ;;  %p1706_p9 = scmp.ne.s32.totalorder %s145_s23, %s1705_s27 }
   0xc   : > { %p1713_p12 = scmp.lt.s32.totalorder %s145_s23, %s145_s23  ;;  %p1714_p13 = scmp.lt.s32.totalorder %s1705_s27, %s1705_s27 }
   0xd   : > { %p1914_p7 = pnand %p1617_p6, %p1894_p1 }
   0xe   : > { %p1715_p0 = por %p1714_p13, %p1713_p12 }
   0xf   : > { %p1696_p8 = pneg %p1914_p7 }
  0x11   : > { %p1708_p10 = pnand %p1706_p9, %p1696_p8 }
  0x13   : > { %p1709_p11 = pneg %p1708_p10 }
  0x15   : > { %p1716_p2 = pnand %p1715_p0, %p1709_p11 }
  0x17   : > { %1719 = shalt.err (!%p1716_p2)
}
  0x18   : > { %s1840_s28 = smov 128   ;;  %s1841_s29 = smov 8  }
  0x19   : > { %1620 = dma.hbm_to_vmem [thread:$0]  (!%p1914_p7), %s2061_s1, 256, %s145_s23, [#allocation5], %s1840_s28, %s1840_s28, %s1841_s29  }
  0x1a   : > { %s1731_s5 = scalar_lea.vmem %s158_s26, 256  ;;  %p1739_p10 = scmp.lt.s32.totalorder %s158_s26, %s158_s26 }
  0x1b   : > { %p1732_p3 = scmp.ne.s32.totalorder %s158_s26, %s1731_s5  ;;  %p1740_p11 = scmp.lt.s32.totalorder %s1731_s5, %s1731_s5 }
  0x1d   : > { %p1734_p6 = pnand %p1732_p3, %p1696_p8  ;;  %p1741_p12 = por %p1740_p11, %p1739_p10 }
  0x1f   : > { %p1735_p9 = pneg %p1734_p6 }
  0x21   : > { %p1742_p13 = pnand %p1741_p12, %p1735_p9 }
  0x23   : > { %1745 = shalt.err (!%p1742_p13)
}
  0x24   : > { %1623 = dma.hbm_to_vmem [thread:$0]  (!%p1914_p7), %s2062_s2, 256, %s158_s26, [#allocation5], %s1840_s28, %s1840_s28, %s1841_s29  }
  0x25   : > { %s29_s8 = sadd.s32 1, %s1828_s16  ;;  %s38_s9 = sadd.s32 1, %s1820_s14 }
  0x26   : > { %p31_p8 = scmp.ge.s32.totalorder %s29_s8, 2  ;;  %p45_p0 = scmp.ne.s32.totalorder %s1820_s14, %s1816_s13 }
  0x27   : > { %p46_p2 = scmp.eq.s32.totalorder %s1832_s17, 0  ;;  %p1630_p3 = scmp.lt.s32.totalorder %s1832_s17, 2 }
  0x28   : > { %s2075_s8 = smov (%p31_p8, %s29_s8), 0  ;;  %s171_s10 = sand.u32 1, %s1820_s14  }
  0x29   : > { %p47_p6 = por %p46_p2, %p45_p0  ;;  %s33_s11 = ssub.s32 %s1828_s16, %s2075_s8 }
  0x2a   : > { %p36_p9 = scmp.eq.s32.totalorder %s33_s11, 0  ;;  %s1446_s12 = sshll.u32 %s171_s10, 6 }
  0x2b   : > { %s1469_s18 = sshll.u32 %s1828_s16, 10  ;;  %s175_s26 = scalar_lea.vmem [#allocation2], %s1446_s12 }
  0x2c   : > { %s1955_s22 = scalar_select %p36_p9, %s1820_s14, %s38_s9  }
  0x2d   : > { %s184_s25 = scalar_lea.hbm %s2060_s0, %s1469_s18  ;;  %s185_s27 = sshll.u32 %s175_s26, 4  ;;  %s186_s27 = int_to_ptr.vmem [resolvable:$true] %s185_s27 }
  0x2e   : > { %p1962_p7 = pnand %p1630_p3, %p47_p6  ;;  %s172_s4 = scalar_lea.sflag [#allocation3], %s171_s10 }
  0x2f   : > { %s1759_s5 = scalar_lea.vmem %s186_s27, 1024  ;;  %s1842_s6 = smov [#allocation2]  }
  0x30   : > { %p1748_p10 = pneg %p1962_p7  ;;  %p1760_p11 = scmp.ne.s32.totalorder %s186_s27, %s1759_s5 }
  0x31   : > { %s1764_s7 = sshll.u32 %s1842_s6, 4  ;;  %s1765_s7 = int_to_ptr.vmem [resolvable:$false] %s1764_s7 }
  0x32   : > { %p1762_p12 = pnand %p1760_p11, %p1748_p10  ;;  %s1766_s9 = scalar_lea.vmem %s1765_s7, 2048 }
  0x33   : > { %p1767_p8 = scmp.lt.s32.totalorder %s186_s27, %s1765_s7  ;;  %p1768_p0 = scmp.lt.s32.totalorder %s1766_s9, %s1759_s5 }
  0x34   : > { %p1763_p13 = pneg %p1762_p12 }
  0x35   : > { %p1769_p2 = por %p1768_p0, %p1767_p8 }
  0x37   : > { %p1770_p9 = pnand %p1769_p2, %p1763_p13 }
  0x39   : > { %1773 = shalt.err (!%p1770_p9)
}
  0x3a   : > { %1627 = dma.hbm_to_vmem [thread:$0]  (!%p1962_p7), %s184_s25, 1024, %s186_s27, %s172_s4, %s1840_s28, %s1840_s28, %s1841_s29  }
  0x3b   : > { %197 = sbr.rel (%p1906_p5) target bundleno = 635 (0x27b), region = 32  ;;  %s199_s10 = sand.u32 (!%p1906_p5), 1, %s1816_s13  }
  0x3c   : > { %s1976_s11 = sshll.u32 (!%p1906_p5), %s199_s10, 6  ;;  %s200_s12 = scalar_lea.sflag (!%p1906_p5), [#allocation3], %s199_s10 }
  0x3d   : > { %s203_s18 = scalar_lea.vmem (!%p1906_p5), [#allocation2], %s1976_s11 }
  0x40   : > { %1803 = dma.done.wait (%p1902_p4), %s200_s12, 1024  }
  0x41   : > { %1805 = vsyncadd (%p1902_p4), %s200_s12, 4294966272 }
  0x42   : > { %1807 = dma.done.wait (%p1894_p1), [#allocation5], 512  }
  0x43   : > { %1809 = vsyncadd (%p1894_p1), [#allocation5], 4294966784  ;;  %p240_p5 = scmp.lt.s32.totalorder %s1824_s15, 1  ;;  %v1994_v0 = vld [vmem:[#allocation4] sm:$0xff]  ;;  %v1996_v1 = vld [vmem:[#allocation4 + $0x8] sm:$0xff]  ;;  %s2002_s19 = smov 0  }
  0x44   : > { %v1998_v2 = vld [vmem:[#allocation6] sm:$0xff]  ;;  %v2000_v3 = vld [vmem:[#allocation6 + $0x8] sm:$0xff] }
  0x45   : > { %s2077_s15 = smov (!%p240_p5, %s1824_s15), 1 }
  0x46   : > { %s1470_s21 = sshll.u32 %s2077_s15, 7 }
  0x47   : > { %s1992_s23 = scalar_lea.vmem %s2063_s3, %s1470_s21 }
  0x48 LB: >> { %v299_v4 = vand.u32 4294901760, %v1996_v1  ;;  %v302_v5 = vand.u32 4294901760, %v1994_v0  ;;  %s1455_s15 = sshll.u32 %s1836_s19, 4  ;;  %vm263_vm0 = vcmask 130048   ;;  %s1471_s24 = sshll.u32 %s1836_s19, 5  ;;  %vm1283_vm1 = vcmask 64512   ;;  %s1836_s19 = sphi %s2002_s19, %s258_s19  }
  0x49   : >> { %s260_s20 = scalar_lea.vmem %s203_s18, %s1455_s15 [#allocation2]  ;;  %v773_v28 = vsel %vm263_vm0, %v1998_v2, 0  ;;  %v776_v35 = vsel %vm263_vm0, %v2000_v3, 0  ;;  %s1282_s25 = scalar_lea.vmem %s1992_s23, %s1471_s24 }
  0x4a   : >> { %1523 = vmatprep.subr.mxu0 %v299_v4  ;;  %v387_v6 = vsub.f32 %v1996_v1, %v299_v4  ;;  %v394_v7 = vsub.f32 %v1994_v0, %v302_v5  ;;  %v261_v10 = vld [vmem:[%s260_s20] sm:$0xff]  ;;  %v262_v11 = vld [vmem:[%s260_s20 + $0x8] sm:$0xff]  ;;  %v2018_v29 = vand.u32 4294901760, %v773_v28  ;;  %v2028_v38 = vand.u32 4294901760, %v776_v35  ;;  %s1843_s26 = smov 120   ;;  %s258_s19 = sadd.s32 1, %s1836_s19  }
  0x4b   : >> { %1524 = vmatpush3.msra.mxu0 %v299_v4  ;;  %v265_v12 = vsel %vm263_vm0, %v261_v10, 0  ;;  %v268_v13 = vsel %vm263_vm0, %v262_v11, 0  ;;  %p255_p1 = scmp.ge.s32.totalorder %s258_s19, 4  }
  0x4c   : >> { %v388_v8 = vand.u32 4294901760, %v387_v6  ;;  %1525 = vmatprep.subr.mxu0 %v302_v5  ;;  %v395_v9 = vand.u32 4294901760, %v394_v7  ;;  %v337_v16 = vand.u32 4294901760, %v265_v12  ;;  %v347_v17 = vand.u32 4294901760, %v268_v13 }
  0x4d   : >> { %1526 = vmatpush3.msra.mxu0 %v302_v5  ;;  %v2021_v30 = vsub.f32 %v773_v28, %v2018_v29  ;;  %v856_v43 = vsub.f32 %v776_v35, %v2028_v38 }
  0x4e   : >> { %v389_v14 = vsub.f32 %v387_v6, %v388_v8  ;;  %v396_v15 = vsub.f32 %v394_v7, %v395_v9  ;;  %1537 = vmatprep.subr.mxu0 %v387_v6  ;;  %v338_v20 = vsub.f32 %v265_v12, %v337_v16  ;;  %1534 = vmatprep.mubr.f32.mxu1 %v337_v16 }
  0x4f   : >> { %v348_v21 = vsub.f32 %v268_v13, %v347_v17  ;;  %v847_v31 = vand.u32 4294901760, %v2021_v30  ;;  %v857_v50 = vand.u32 4294901760, %v856_v43 }
  0x50   : >> { %v390_v18 = vand.u32 4294901760, %v389_v14  ;;  %v397_v19 = vand.u32 4294901760, %v396_v15  ;;  %v339_v22 = vand.u32 4294901760, %v338_v20 }
  0x51   : >> { %v349_v23 = vand.u32 4294901760, %v348_v21  ;;  %v848_v32 = vsub.f32 %v2021_v30, %v847_v31  ;;  %v858_v58 = vsub.f32 %v856_v43, %v857_v50 }
  0x52   : >> { %1530 = vmatprep.subr.mxu1 %v390_v18  ;;  %v340_v24 = vsub.f32 %v338_v20, %v339_v22 }
  0x53   : >> { %1531 = vmatpush3.msra.mxu1 %v390_v18  ;;  %v350_v25 = vsub.f32 %v348_v21, %v349_v23  ;;  %v849_v33 = vand.u32 4294901760, %v848_v32 }
  0x54   : >> { %1532 = vmatprep.subr.mxu1 %v397_v19  ;;  %v341_v26 = vand.u32 4294901760, %v340_v24 }
  0x55   : >> { %1533 = vmatpush3.msra.mxu1 %v397_v19  ;;  %v351_v27 = vand.u32 4294901760, %v350_v25 }
  0x56   : >> { %1535 = vmatmul.mubr.f32.vlgmr.msra.gmra.mxu1 %v347_v17  ;;  %1544 = vmatprep.subr.mxu1 %v299_v4 }
  0x57   : >> { %1545 = vmatpush3.msra.mxu1 %v299_v4  ;;  %1548 = vmatprep.mubr.f32.mxu1 %v339_v22 }
  0x58   : >> { %1527 = vmatprep.mubr.f32.mxu0 %v341_v26  ;;  %1546 = vmatprep.subr.mxu1 %v302_v5 }
  0x59   : >> { %1528 = vmatmul.mubr.f32.vlgmr.msra.gmra.mxu0 %v351_v27  ;;  %1547 = vmatpush3.msra.mxu1 %v302_v5 }
  0x5a   : >> { %1538 = vmatpush3.msra.mxu0 %v387_v6  ;;  %1541 = vmatprep.mubr.f32.mxu0 %v338_v20 }
  0x5b   : >> { %1539 = vmatprep.subr.mxu0 %v394_v7  ;;  %1549 = vmatmul.mubr.f32.vlgmr.msra.gmra.mxu1 %v349_v23 }
  0x5c   : >> { %1540 = vmatpush3.msra.mxu0 %v394_v7  ;;  %1558 = vmatprep.subr.mxu1 %v299_v4 }
  0x5d   : >> { %1542 = vmatmul.mubr.f32.vlgmr.msra.gmra.mxu0 %v348_v21  ;;  %1551 = vmatprep.subr.mxu0 %v388_v8 }
  0x5e   : >> { %1552 = vmatpush3.msra.mxu0 %v388_v8  ;;  %1559 = vmatpush3.msra.mxu1 %v299_v4  ;;  %v859_v4 = vand.u32 4294901760, %v858_v58 }
  0x5f   : >> { %1553 = vmatprep.subr.mxu0 %v395_v9  ;;  %1560 = vmatprep.subr.mxu1 %v302_v5 }
  0x60   : >> { %1554 = vmatpush3.msra.mxu0 %v395_v9  ;;  %1555 = vmatprep.mubr.f32.mxu0 %v337_v16 }
  0x61   : >> { %1561 = vmatpush3.msra.mxu1 %v302_v5  ;;  %1562 = vmatprep.mubr.f32.mxu1 %v337_v16 }
  0x62   : >> { %1556 = vmatmul.mubr.f32.vlgmr.msra.gmra.mxu0 %v347_v17  ;;  %1563 = vmatmul.mubr.f32.vlgmr.msra.gmra.mxu1 %v347_v17 }
  0x63   : >> { %1576 = vmatprep.mubr.f32.mxu1 %v2018_v29  ;;  %1569 = vmatprep.mubr.f32.mxu0 %v849_v33 }
 0x116   : >> { %v1536_v34 = vpop.f32.mrf.mxu1 }
 0x118   : >> { %v434_v36 = vpop.f32.mrf.mxu1 }
 0x119   : >> { %v1529_v37 = vpop.f32.mrf.mxu0 }
 0x11a   : >> { %v441_v41 = vadd.f32 %v1536_v34, %v1529_v37 }
 0x11b   : >> { %v343_v39 = vpop.f32.mrf.mxu0  ;;  %v1550_v40 = vpop.f32.mrf.mxu1 }
 0x11c   : >> { %v435_v44 = vadd.f32 %v434_v36, %v343_v39 }
 0x11d   : >> { %v1543_v42 = vpop.f32.mrf.mxu0  ;;  %v598_v46 = vpop.f32.mrf.mxu1 }
 0x11e   : >> { %v524_v45 = vadd.f32 %v1543_v42, %v441_v41 }
 0x11f   : >> { %v516_v47 = vpop.f32.mrf.mxu0 }
 0x120   : >> { %v607_v48 = vadd.f32 %v1550_v40, %v524_v45  ;;  %v517_v49 = vadd.f32 %v516_v47, %v435_v44 }
 0x122   : >> { %v599_v51 = vadd.f32 %v598_v46, %v517_v49  ;;  %v1557_v52 = vpop.f32.mrf.mxu0  ;;  %v1564_v53 = vpop.f32.mrf.mxu1 }
 0x123   : >> { %v690_v54 = vadd.f32 %v1557_v52, %v607_v48 }
 0x124   : >> { %v683_v55 = vpop.f32.mrf.mxu0  ;;  %v762_v59 = vpop.f32.mrf.mxu1 }
 0x125   : >> { %v769_v56 = vadd.f32 %v1564_v53, %v690_v54  ;;  %v684_v57 = vadd.f32 %v683_v55, %v599_v51 }
 0x127   : >> { %v807_v60 = vand.u32 4294901760, %v769_v56  ;;  %v763_v61 = vadd.f32 %v762_v59, %v684_v57 }
 0x129   : >> { %v895_v62 = vsub.f32 %v769_v56, %v807_v60  ;;  %v810_v63 = vand.u32 4294901760, %v763_v61  ;;  %1565 = vmatprep.subr.mxu0 %v807_v60 }
 0x12a   : >> { %1566 = vmatpush3.msra.mxu0 %v807_v60 }
 0x12b   : >> { %v902_v5 = vsub.f32 %v763_v61, %v810_v63  ;;  %1567 = vmatprep.subr.mxu0 %v810_v63  ;;  %v896_v6 = vand.u32 4294901760, %v895_v62 }
 0x12c   : >> { %1568 = vmatpush3.msra.mxu0 %v810_v63 }
 0x12d   : >> { %1579 = vmatprep.subr.mxu0 %v895_v62  ;;  %1570 = vmatmul.mubr.f32.vlgmr.msra.gmra.mxu0 %v859_v4  ;;  %v897_v7 = vsub.f32 %v895_v62, %v896_v6  ;;  %v903_v8 = vand.u32 4294901760, %v902_v5 }
 0x12e   : >> { %1580 = vmatpush3.msra.mxu0 %v895_v62  ;;  %1583 = vmatprep.mubr.f32.mxu0 %v2021_v30 }
 0x12f   : >> { %1581 = vmatprep.subr.mxu0 %v902_v5  ;;  %v898_v9 = vand.u32 4294901760, %v897_v7  ;;  %v904_v10 = vsub.f32 %v902_v5, %v903_v8 }
 0x130   : >> { %1582 = vmatpush3.msra.mxu0 %v902_v5 }
 0x131   : >> { %1572 = vmatprep.subr.mxu1 %v898_v9  ;;  %1593 = vmatprep.subr.mxu0 %v896_v6  ;;  %v905_v11 = vand.u32 4294901760, %v904_v10 }
 0x132   : >> { %1573 = vmatpush3.msra.mxu1 %v898_v9  ;;  %1584 = vmatmul.mubr.f32.vlgmr.msra.gmra.mxu0 %v856_v43 }
 0x133   : >> { %1594 = vmatpush3.msra.mxu0 %v896_v6  ;;  %1574 = vmatprep.subr.mxu1 %v905_v11 }
 0x134   : >> { %1595 = vmatprep.subr.mxu0 %v903_v8  ;;  %1575 = vmatpush3.msra.mxu1 %v905_v11 }
 0x135   : >> { %1596 = vmatpush3.msra.mxu0 %v903_v8  ;;  %1577 = vmatmul.mubr.f32.vlgmr.msra.gmra.mxu1 %v2028_v38 }
 0x136   : >> { %1586 = vmatprep.subr.mxu1 %v807_v60  ;;  %1590 = vmatprep.mubr.f32.mxu1 %v847_v31 }
 0x137   : >> { %1587 = vmatpush3.msra.mxu1 %v807_v60  ;;  %1597 = vmatprep.mubr.f32.mxu0 %v2018_v29 }
 0x138   : >> { %1588 = vmatprep.subr.mxu1 %v810_v63  ;;  %1598 = vmatmul.mubr.f32.vlgmr.msra.gmra.mxu0 %v2028_v38 }
 0x139   : >> { %1589 = vmatpush3.msra.mxu1 %v810_v63 }
 0x13a   : >> { %1591 = vmatmul.mubr.f32.vlgmr.msra.gmra.mxu1 %v857_v50  ;;  %1600 = vmatprep.subr.mxu1 %v807_v60 }
 0x13b   : >> { %1601 = vmatpush3.msra.mxu1 %v807_v60  ;;  %1604 = vmatprep.mubr.f32.mxu1 %v2018_v29 }
 0x13c   : >> { %1602 = vmatprep.subr.mxu1 %v810_v63 }
 0x13d   : >> { %1603 = vmatpush3.msra.mxu1 %v810_v63 }
 0x13e   : >> { %1605 = vmatmul.mubr.f32.vlgmr.msra.gmra.mxu1 %v2028_v38 }
 0x1ed   : >> { %v1571_v12 = vpop.f32.mrf.mxu0 }
 0x1ef   : >> { %v851_v13 = vpop.f32.mrf.mxu0 }
 0x1f2   : >> { %v1585_v14 = vpop.f32.mrf.mxu0 }
 0x1f4   : >> { %v1024_v17 = vpop.f32.mrf.mxu0 }
 0x1f5   : >> { %v1578_v15 = vpop.f32.mrf.mxu1 }
 0x1f6   : >> { %v949_v16 = vadd.f32 %v1578_v15, %v1571_v12 }
 0x1f7   : >> { %v942_v18 = vpop.f32.mrf.mxu1 }
 0x1f8   : >> { %v1032_v19 = vadd.f32 %v1585_v14, %v949_v16  ;;  %v943_v20 = vadd.f32 %v942_v18, %v851_v13  ;;  %v1599_v23 = vpop.f32.mrf.mxu0 }
 0x1fa   : >> { %v1025_v21 = vadd.f32 %v1024_v17, %v943_v20  ;;  %v1592_v22 = vpop.f32.mrf.mxu1  ;;  %v1191_v28 = vpop.f32.mrf.mxu0 }
 0x1fb   : >> { %v1115_v24 = vadd.f32 %v1592_v22, %v1032_v19 }
 0x1fc   : >> { %v1106_v25 = vpop.f32.mrf.mxu1 }
 0x1fd   : >> { %v1198_v26 = vadd.f32 %v1599_v23, %v1115_v24  ;;  %v1107_v27 = vadd.f32 %v1106_v25, %v1025_v21 }
 0x1fe   : >> { %v1606_v29 = vpop.f32.mrf.mxu1 }
 0x1ff   : >> { %v1192_v30 = vadd.f32 %v1191_v28, %v1107_v27  ;;  %v1277_v31 = vadd.f32 %v1606_v29, %v1198_v26 }
 0x200   : >> { %v1270_v32 = vpop.f32.mrf.mxu1 }
 0x201   : >> { %1463 = vst.msk [vmem:[%s1282_s25 + $0x10] sm:$0xff] %vm1283_vm1, %v1277_v31  ;;  %v1271_v33 = vadd.f32 %v1270_v32, %v1192_v30 }
 0x203   : >> { %1284 = vst.msk [vmem:[%s1282_s25] sm:$0xff] %vm1283_vm1, %v1271_v33  ;;  %1287 = vrot.lane.b32.xlu0 %v1271_v33, %s1843_s26 }
 0x207   : >> { %1299 = vrot.lane.b32.xlu0 %v1277_v31, %s1843_s26 }
 0x275   : >> { %v1288_v34 = vpop.permute.xlu0 %1287 }
 0x276   : >> { %1460 = vst.msk [vmem:[%s1282_s25 + $0x8] sm:$0xff] %vm1283_vm1, %v1288_v34  ;;  %257 = sbr.rel (!%p255_p1) target bundleno = 72 (0x48), region = 92 }
 0x279   : >> { %v1300_v35 = vpop.permute.xlu0 %1299 }
 0x27a   : >> { %1466 = vst.msk [vmem:[%s1282_s25 + $0x18] sm:$0xff] %vm1283_vm1, %v1300_v35 }
 0x27b PF: > { %s17_s17 = sadd.s32 1, %s1832_s17   ;;  %s2069_s12 = smov %s1816_s13 }
 0x27c   : > { %p14_p4 = scmp.ge.s32.totalorder %s17_s17, 4   ;;  %s2070_s13 = smov %s1820_s14 }
 0x27d   : > { %s2071_s14 = smov %s1955_s22  ;;  %s2072_s15 = smov %s1828_s16 }
 0x27e   : > { %s2073_s16 = smov %s2075_s8  ;;  %16 = sbr.rel (!%p14_p4) target bundleno = 5 (0x5), region = 103 }
 0x283   :  { %1335 = vsyncpa [#allocation3], 1 }
 0x284   :  { %1337 = vsyncpa [#allocation3 + $0x1], 1 }
 0x285   :  { %1338 = vsyncpa [#allocation5], 1 }

</bundles_post_ra>
